<compile_context>
chip_gen: v6e
topology: v6e:2x2x1
jax: 0.10.0
libtpu: 0.0.40
codegen_flags: <defaults>
</compile_context>

<pallas_src>
import math

import jax
import jax.numpy as jnp
import numpy as np
from jax import lax
from jax.experimental import pallas as pl
from jax.experimental.pallas import tpu as pltpu

WINDOW_SIZE = 11
SIGMA = 1.5
NUM_MAPS = 5  # x1, x2, x1*x1, x2*x2, x1*x2

_VMEM_BUDGET_BYTES = 40 * 1024 * 1024   # v7x-safe working-set budget (64 MiB physical)
_VMEM_LIMIT_CAP = 48 * 1024 * 1024      # never request more scoped VMEM than this
_DENSE_KRON_MAX_F = 1024                # above this, switch to the separable H/W path


def gaussian_1d(window_size: int, sigma: float) -> np.ndarray:
    g = np.array(
        [
            math.exp(-((x - window_size // 2) ** 2) / float(2 * sigma**2))
            for x in range(window_size)
        ],
        dtype=np.float64,
    )
    return g / g.sum()


def band_matrix(g: np.ndarray, n: int) -> np.ndarray:
    """(n, n) matrix M with M[i, j] = g[i - j + half].

    x @ M equals the zero-padded 'same' cross-correlation of x with g along its
    last axis (identical to torch F.conv3d boundary handling)."""
    ws = len(g)
    half = ws // 2
    m = np.zeros((n, n), dtype=np.float64)
    for j in range(n):
        for i in range(max(0, j - half), min(n, j + half + 1)):
            m[i, j] = g[i - j + half]
    return m


def _vmem_bytes(bb: int, D: int, H: int, W: int, use_kron: bool, mm_bytes: int) -> int:
    """Rough per-step VMEM bill (blocks double-buffered + scratch + intermediates)."""
    F = H * W
    if use_kron:
        const_bytes = 2 * (F * F + D * D) * mm_bytes
    else:
        const_bytes = 2 * (W * W + H * H + D * D) * mm_bytes
    # 2 inputs x 2 buffers (f32) + f32 stacked scratch + matmul-dtype copies of the
    # stacked/y operands + f32 y/z + ~8 f32 SSIM temporaries, all per volume.
    per_vol = D * F * (2 * 2 * 4 + NUM_MAPS * 4 + 2 * NUM_MAPS * mm_bytes
                       + 2 * NUM_MAPS * 4 + 8 * 4)
    return const_bytes + bb * per_vol


def _pick_bb(B: int, D: int, H: int, W: int, use_kron: bool, mm_bytes: int) -> int:
    """Largest Bb that fits the v7x-safe VMEM budget, MXU-row friendly, capped at B."""
    const_bytes = _vmem_bytes(0, D, H, W, use_kron, mm_bytes)
    per_vol = _vmem_bytes(1, D, H, W, use_kron, mm_bytes) - const_bytes
    bb = max(1, int((_VMEM_BUDGET_BYTES - const_bytes) // max(per_vol, 1)))
    # Prefer 5*Bb*D to be a multiple of 256 MXU rows when we can afford it.
    align = 256 // math.gcd(256, NUM_MAPS * D)
    if bb >= align:
        bb = (bb // align) * align
    return int(min(B, bb))


def _make_kernel(Bb, D, H, W, use_kron, matmul_dtype, num_blocks, n_valid_last, has_tail):
    F = H * W

    def kernel(*refs):
        if use_kron:
            khw_ref, gdt_ref, x1_ref, x2_ref, out_ref, stack_ref = refs
        else:
            gw_ref, gh_ref, gdt_ref, x1_ref, x2_ref, out_ref, stack_ref = refs

        x1 = x1_ref[...]  # (Bb, D, F) float32
        x2 = x2_ref[...]

        # Five blur inputs written straight into persistent VMEM scratch (no
        # jnp.concatenate copy); squares/products are computed in f32.
        stack_ref[0 * Bb:1 * Bb] = x1
        stack_ref[1 * Bb:2 * Bb] = x2
        stack_ref[2 * Bb:3 * Bb] = x1 * x1
        stack_ref[3 * Bb:4 * Bb] = x2 * x2
        stack_ref[4 * Bb:5 * Bb] = x1 * x2

        stacked = stack_ref[...].astype(matmul_dtype)  # (5*Bb, D, F)

        if use_kron:
            # Fused H+W blur: one lane-dense banded-Kronecker matmul on the MXU.
            y = jnp.dot(stacked.reshape(NUM_MAPS * Bb * D, F), khw_ref[...],
                        preferred_element_type=jnp.float32)
            y = y.reshape(NUM_MAPS * Bb, D, F)
        else:
            # Separable fallback for large H*W: W-band matmul, then H blur after a
            # minor-dim transpose.  Spatial order becomes (W, H), which is fine:
            # everything downstream is elementwise plus a full reduction.
            yw = jnp.dot(stacked.reshape(NUM_MAPS * Bb * D * H, W), gw_ref[...],
                         preferred_element_type=jnp.float32)
            yt = jnp.swapaxes(yw.reshape(NUM_MAPS * Bb * D, H, W), 1, 2)
            yh = jnp.dot(yt.reshape(NUM_MAPS * Bb * D * W, H).astype(matmul_dtype),
                         gh_ref[...], preferred_element_type=jnp.float32)
            y = yh.reshape(NUM_MAPS * Bb, D, F)

        # D Gaussian blur: batched banded matmul with the single (D, D) band matrix
        # broadcast in-kernel (tiny) instead of a 5*Bb-fold HBM copy.
        gdt = jnp.broadcast_to(gdt_ref[...][None], (NUM_MAPS * Bb, D, D))
        z = jnp.einsum("skd,sdf->skf", gdt, y.astype(matmul_dtype),
                       preferred_element_type=jnp.float32)  # (5*Bb, D, F)

        mu1 = z[0 * Bb:1 * Bb]
        mu2 = z[1 * Bb:2 * Bb]
        e11 = z[2 * Bb:3 * Bb]
        e22 = z[3 * Bb:4 * Bb]
        e12 = z[4 * Bb:5 * Bb]

        mu1_sq = mu1 * mu1
        mu2_sq = mu2 * mu2
        mu1_mu2 = mu1 * mu2
        sigma1_sq = e11 - mu1_sq
        sigma2_sq = e22 - mu2_sq
        sigma12 = e12 - mu1_mu2

        c1 = 0.01**2
        c2 = 0.03**2
        ssim_map = ((2.0 * mu1_mu2 + c1) * (2.0 * sigma12 + c2)) / (
            (mu1_sq + mu2_sq + c1) * (sigma1_sq + sigma2_sq + c2)
        )

        if has_tail:
            # Only the last block contains zero-padded volumes; mask them out.
            n_valid = jnp.where(pl.program_id(0) == num_blocks - 1, n_valid_last, Bb)
            vol = lax.broadcasted_iota(jnp.int32, ssim_map.shape, 0)
            ssim_map = jnp.where(vol < n_valid, ssim_map, 0.0)

        # Per-block partial sum; the global mean is finished in the wrapper.
        out_ref[...] = jnp.full((1, 1, 1), jnp.sum(ssim_map), dtype=out_ref.dtype)

    return kernel


def ssim3d(img1, img2, window_size=WINDOW_SIZE, size_average=True,
           matmul_dtype=jnp.float32):
    """SSIM3D.forward equivalent. img1, img2: (N, C, D, H, W) float32.

    matmul_dtype=jnp.bfloat16 enables full-rate MXU blurs (f32 squares + f32
    accumulation are kept); default float32 matches the reference bit-closely."""
    if not size_average:
        # TODO(synk): size_average=False branch (mean(1).mean(1).mean(1)) not implemented.
        raise NotImplementedError("size_average=False is not implemented")

    assert img1.shape == img2.shape
    N, C, D, H, W = img1.shape
    B = N * C
    F = H * W
    assert B >= 1

    mm_bytes = int(np.dtype(matmul_dtype).itemsize)
    use_kron = F <= _DENSE_KRON_MAX_F

    g = gaussian_1d(window_size, SIGMA)
    m_w = band_matrix(g, W)
    m_h = band_matrix(g, H)
    m_d = band_matrix(g, D)

    # Block size over the batch axis, VMEM-budgeted (v7x-safe) and capped at B.
    Bb = _pick_bb(B, D, H, W, use_kron, mm_bytes)
    num_blocks = int(pl.cdiv(B, Bb))
    B_pad = num_blocks * Bb
    n_valid_last = B - (num_blocks - 1) * Bb
    has_tail = B_pad != B

    # (N, C, D, H, W) -> (B, D, H*W): pure metadata reshape in HBM (no pad copy).
    x1 = jnp.reshape(img1.astype(jnp.float32), (B, D, F))
    x2 = jnp.reshape(img2.astype(jnp.float32), (B, D, F))
    if has_tail:
        pad = ((0, B_pad - B), (0, 0), (0, 0))
        x1 = jnp.pad(x1, pad)
        x2 = jnp.pad(x2, pad)

    # Single (D, D) transposed band matrix (broadcast inside the kernel).
    gdt = jnp.asarray(np.ascontiguousarray(m_d.T), dtype=matmul_dtype)

    if use_kron:
        # kron(M_H, M_W): applying it on the flattened (H*W) axis performs the
        # separable H and W blurs in a single lane-dense matmul.
        khw = jnp.asarray(np.kron(m_h, m_w), dtype=matmul_dtype)           # (F, F)
        blur_ops = (khw,)
        blur_specs = [pl.BlockSpec((F, F), lambda b: (0, 0))]
    else:
        gw = jnp.asarray(m_w, dtype=matmul_dtype)                           # (W, W)
        gh = jnp.asarray(m_h, dtype=matmul_dtype)                           # (H, H)
        blur_ops = (gw, gh)
        blur_specs = [pl.BlockSpec((W, W), lambda b: (0, 0)),
                      pl.BlockSpec((H, H), lambda b: (0, 0))]

    # Only request a larger scoped VMEM limit when the budgeted working set needs
    # it (kept <= 48 MiB so it is valid on v7x's 64 MiB VMEM as well).
    est_vmem = _vmem_bytes(Bb, D, H, W, use_kron, mm_bytes)
    vmem_limit = None
    if est_vmem > 16 * 1024 * 1024:
        vmem_limit = int(min(max(est_vmem * 5 // 4, 32 * 1024 * 1024), _VMEM_LIMIT_CAP))

    kernel = _make_kernel(Bb, D, H, W, use_kron, matmul_dtype,
                          num_blocks, n_valid_last, has_tail)

    partials = pl.pallas_call(
        kernel,
        out_shape=jax.ShapeDtypeStruct((num_blocks, 1, 1), jnp.float32),
        grid_spec=pltpu.PrefetchScalarGridSpec(
            num_scalar_prefetch=0,
            grid=(num_blocks,),
            in_specs=blur_specs + [
                pl.BlockSpec((D, D), lambda b: (0, 0)),          # gdt (constant)
                pl.BlockSpec((Bb, D, F), lambda b: (b, 0, 0)),   # x1 block
                pl.BlockSpec((Bb, D, F), lambda b: (b, 0, 0)),   # x2 block
            ],
            out_specs=pl.BlockSpec((1, 1, 1), lambda b: (b, 0, 0)),
            scratch_shapes=[pltpu.VMEM((NUM_MAPS * Bb, D, F), jnp.float32)],
        ),
        compiler_params=pltpu.CompilerParams(
            dimension_semantics=("parallel",),
            vmem_limit_bytes=vmem_limit,
        ),
    )(*blur_ops, gdt, x1, x2)

    total = float(B * D * H * W)
    return jnp.sum(partials) / total


def _ssim3d_reference(img1, img2, window_size=WINDOW_SIZE):
    """Pure NumPy (float64) reference: separable zero-padded Gaussian blur."""
    g = gaussian_1d(window_size, SIGMA)
    half = window_size // 2
    N, C, D, H, W = img1.shape
    x1 = np.asarray(img1, dtype=np.float64).reshape(N * C, D, H, W)
    x2 = np.asarray(img2, dtype=np.float64).reshape(N * C, D, H, W)

    def blur(x):
        out = np.zeros_like(x)
        xp = np.pad(x, ((0, 0), (half, half), (0, 0), (0, 0)))
        for t in range(window_size):
            out += g[t] * xp[:, t:t + D]
        x = out
        out = np.zeros_like(x)
        xp = np.pad(x, ((0, 0), (0, 0), (half, half), (0, 0)))
        for t in range(window_size):
            out += g[t] * xp[:, :, t:t + H]
        x = out
        out = np.zeros_like(x)
        xp = np.pad(x, ((0, 0), (0, 0), (0, 0), (half, half)))
        for t in range(window_size):
            out += g[t] * xp[:, :, :, t:t + W]
        return out

    mu1, mu2 = blur(x1), blur(x2)
    e11, e22, e12 = blur(x1 * x1), blur(x2 * x2), blur(x1 * x2)
    mu1_sq, mu2_sq, mu1_mu2 = mu1 * mu1, mu2 * mu2, mu1 * mu2
    s1, s2, s12 = e11 - mu1_sq, e22 - mu2_sq, e12 - mu1_mu2
    c1, c2 = 0.01**2, 0.03**2
    m = ((2 * mu1_mu2 + c1) * (2 * s12 + c2)) / ((mu1_sq + mu2_sq + c1) * (s1 + s2 + c2))
    return float(m.mean())


if __name__ == "__main__":
    key = jax.random.PRNGKey(0)
    k1, k2 = jax.random.split(key)
    # Small shapes consistent with the module: (N, C, D, H, W)
    img1 = jax.random.uniform(k1, (2, 1, 16, 16, 16), dtype=jnp.float32)
    img2 = jax.random.uniform(k2, (2, 1, 16, 16, 16), dtype=jnp.float32)

    ssim_fn = jax.jit(ssim3d)

    # Sanity check: SSIM of an image with itself is exactly 1.
    self_ssim = jax.block_until_ready(ssim_fn(img1, img1))
    assert np.isfinite(float(self_ssim))
    assert abs(float(self_ssim) - 1.0) < 1e-3, f"self-SSIM={float(self_ssim)}"

    result = jax.block_until_ready(ssim_fn(img1, img2))
    assert np.isfinite(float(result))

    ref = _ssim3d_reference(np.asarray(img1), np.asarray(img2))
    assert abs(float(result) - ref) < 5e-3, f"pallas={float(result)} ref={ref}"

    # bf16 matmul-input mode (f32 squares + f32 accumulation), per perf review.
    ssim_bf16_fn = jax.jit(lambda a, b: ssim3d(a, b, matmul_dtype=jnp.bfloat16))
    result_bf16 = jax.block_until_ready(ssim_bf16_fn(img1, img2))
    assert np.isfinite(float(result_bf16))
    assert abs(float(result_bf16) - ref) < 2e-2, f"bf16={float(result_bf16)} ref={ref}"

    print("KERNEL_OK")
</pallas_src>

<mosaic_0001>
module attributes {stable_mosaic.version = 11 : i64} {
  func.func @kernel(%arg0: i32, %arg1: memref<256x256xf32, #tpu.memory_space<vmem>>, %arg2: memref<16x16xf32, #tpu.memory_space<vmem>>, %arg3: memref<2x16x256xf32, #tpu.memory_space<vmem>>, %arg4: memref<2x16x256xf32, #tpu.memory_space<vmem>>, %arg5: memref<1x1x1xf32, #tpu.memory_space<vmem>>, %arg6: memref<10x16x256xf32, #tpu.memory_space<vmem>>) attributes {dimension_semantics = [#tpu.dimension_semantics<parallel>], iteration_bounds = array<i64: 1>, scalar_prefetch = 0 : i64, scratch_operands = 1 : i64, tpu.core_type = #tpu.core_type<tc>, window_params = [{pipeline_mode = #tpu.pipeline_mode<synchronous>, transform_indices = @transform_0, window_bounds = array<i64: 256, 256>}, {pipeline_mode = #tpu.pipeline_mode<synchronous>, transform_indices = @transform_1, window_bounds = array<i64: 16, 16>}, {transform_indices = @transform_2, window_bounds = array<i64: 2, 16, 256>}, {transform_indices = @transform_3, window_bounds = array<i64: 2, 16, 256>}, {transform_indices = @transform_4, window_bounds = array<i64: 1, 1, 1>}]} {
    %c0 = arith.constant 0 : index
    %c0_0 = arith.constant 0 : index
    %c0_1 = arith.constant 0 : index
    %0 = vector.load %arg3[%c0, %c0_0, %c0_1] : memref<2x16x256xf32, #tpu.memory_space<vmem>>, vector<2x16x256xf32>
    %c0_2 = arith.constant 0 : index
    %c0_3 = arith.constant 0 : index
    %c0_4 = arith.constant 0 : index
    %1 = vector.load %arg4[%c0_2, %c0_3, %c0_4] : memref<2x16x256xf32, #tpu.memory_space<vmem>>, vector<2x16x256xf32>
    %c0_5 = arith.constant 0 : index
    %c0_6 = arith.constant 0 : index
    %c0_7 = arith.constant 0 : index
    %2 = vector.load %arg6[%c0_5, %c0_6, %c0_7] : memref<10x16x256xf32, #tpu.memory_space<vmem>>, vector<2x16x256xf32>
    tpu.vector_store %arg6[%c0_5, %c0_6, %c0_7], %0 {strides = array<i32>} : memref<10x16x256xf32, #tpu.memory_space<vmem>>, vector<2x16x256xf32>,
    %c2 = arith.constant 2 : index
    %c0_8 = arith.constant 0 : index
    %c0_9 = arith.constant 0 : index
    %3 = vector.load %arg6[%c2, %c0_8, %c0_9] : memref<10x16x256xf32, #tpu.memory_space<vmem>>, vector<2x16x256xf32>
    tpu.vector_store %arg6[%c2, %c0_8, %c0_9], %1 {strides = array<i32>} : memref<10x16x256xf32, #tpu.memory_space<vmem>>, vector<2x16x256xf32>,
    %4 = arith.mulf %0, %0 : vector<2x16x256xf32>
    %c4 = arith.constant 4 : index
    %c0_10 = arith.constant 0 : index
    %c0_11 = arith.constant 0 : index
    %5 = vector.load %arg6[%c4, %c0_10, %c0_11] : memref<10x16x256xf32, #tpu.memory_space<vmem>>, vector<2x16x256xf32>
    tpu.vector_store %arg6[%c4, %c0_10, %c0_11], %4 {strides = array<i32>} : memref<10x16x256xf32, #tpu.memory_space<vmem>>, vector<2x16x256xf32>,
    %6 = arith.mulf %1, %1 : vector<2x16x256xf32>
    %c6 = arith.constant 6 : index
    %c0_12 = arith.constant 0 : index
    %c0_13 = arith.constant 0 : index
    %7 = vector.load %arg6[%c6, %c0_12, %c0_13] : memref<10x16x256xf32, #tpu.memory_space<vmem>>, vector<2x16x256xf32>
    tpu.vector_store %arg6[%c6, %c0_12, %c0_13], %6 {strides = array<i32>} : memref<10x16x256xf32, #tpu.memory_space<vmem>>, vector<2x16x256xf32>,
    %8 = arith.mulf %0, %1 : vector<2x16x256xf32>
    %c8 = arith.constant 8 : index
    %c0_14 = arith.constant 0 : index
    %c0_15 = arith.constant 0 : index
    %9 = vector.load %arg6[%c8, %c0_14, %c0_15] : memref<10x16x256xf32, #tpu.memory_space<vmem>>, vector<2x16x256xf32>
    tpu.vector_store %arg6[%c8, %c0_14, %c0_15], %8 {strides = array<i32>} : memref<10x16x256xf32, #tpu.memory_space<vmem>>, vector<2x16x256xf32>,
    %c0_16 = arith.constant 0 : index
    %c0_17 = arith.constant 0 : index
    %c0_18 = arith.constant 0 : index
    %10 = vector.load %arg6[%c0_16, %c0_17, %c0_18] : memref<10x16x256xf32, #tpu.memory_space<vmem>>, vector<10x16x256xf32>
    %11 = vector.shape_cast %10 : vector<10x16x256xf32> to vector<160x256xf32>
    %c0_19 = arith.constant 0 : index
    %c0_20 = arith.constant 0 : index
    %12 = vector.load %arg1[%c0_19, %c0_20] : memref<256x256xf32, #tpu.memory_space<vmem>>, vector<256x256xf32>
    %cst = arith.constant dense<0.000000e+00> : vector<160x256xf32>
    %13 = tpu.matmul %11, %12, %cst {dimension_numbers = #tpu.dot_dimension_numbers<[1], [0], [0], [1], [0, 0, 1, 1], [], []>} : vector<160x256xf32>, vector<256x256xf32>, vector<160x256xf32> -> vector<160x256xf32>
    %14 = vector.shape_cast %13 : vector<160x256xf32> to vector<10x16x256xf32>
    %c0_21 = arith.constant 0 : index
    %c0_22 = arith.constant 0 : index
    %15 = vector.load %arg2[%c0_21, %c0_22] : memref<16x16xf32, #tpu.memory_space<vmem>>, vector<16x16xf32>
    %16 = vector.shape_cast %15 : vector<16x16xf32> to vector<1x16x16xf32>
    %17 = vector.shape_cast %16 : vector<1x16x16xf32> to vector<1x16x16xf32>
    %18 = vector.broadcast %17 : vector<1x16x16xf32> to vector<10x16x16xf32>
    "tpu.trace_start"() <{level = 10 : i32, message = "skd,sdf->skf"}> : () -> ()
    %cst_23 = arith.constant dense<0.000000e+00> : vector<10x16x256xf32>
    %19 = tpu.matmul %18, %14, %cst_23 {dimension_numbers = #tpu.dot_dimension_numbers<[2], [1], [1], [2], [0, 0, 0, 1, 1, 2], [0], [0]>} : vector<10x16x16xf32>, vector<10x16x256xf32>, vector<10x16x256xf32> -> vector<10x16x256xf32>
    "tpu.trace_stop"() : () -> ()
    %20 = vector.extract_strided_slice %19 {offsets = [0, 0, 0], sizes = [2, 16, 256], strides = [1, 1, 1]} : vector<10x16x256xf32> to vector<2x16x256xf32>
    %21 = vector.extract_strided_slice %19 {offsets = [2, 0, 0], sizes = [2, 16, 256], strides = [1, 1, 1]} : vector<10x16x256xf32> to vector<2x16x256xf32>
    %22 = vector.extract_strided_slice %19 {offsets = [4, 0, 0], sizes = [2, 16, 256], strides = [1, 1, 1]} : vector<10x16x256xf32> to vector<2x16x256xf32>
    %23 = vector.extract_strided_slice %19 {offsets = [6, 0, 0], sizes = [2, 16, 256], strides = [1, 1, 1]} : vector<10x16x256xf32> to vector<2x16x256xf32>
    %24 = vector.extract_strided_slice %19 {offsets = [8, 0, 0], sizes = [2, 16, 256], strides = [1, 1, 1]} : vector<10x16x256xf32> to vector<2x16x256xf32>
    %25 = arith.mulf %20, %20 : vector<2x16x256xf32>
    %26 = arith.mulf %21, %21 : vector<2x16x256xf32>
    %27 = arith.mulf %20, %21 : vector<2x16x256xf32>
    %28 = arith.subf %22, %25 : vector<2x16x256xf32>
    %29 = arith.subf %23, %26 : vector<2x16x256xf32>
    %30 = arith.subf %24, %27 : vector<2x16x256xf32>
    %cst_24 = arith.constant 2.000000e+00 : f32
    %31 = vector.broadcast %cst_24 : f32 to vector<2x16x256xf32>
    %32 = arith.mulf %31, %27 : vector<2x16x256xf32>
    %cst_25 = arith.constant 9.99999974E-5 : f32
    %33 = vector.broadcast %cst_25 : f32 to vector<2x16x256xf32>
    %34 = arith.addf %32, %33 : vector<2x16x256xf32>
    %cst_26 = arith.constant 2.000000e+00 : f32
    %35 = vector.broadcast %cst_26 : f32 to vector<2x16x256xf32>
    %36 = arith.mulf %35, %30 : vector<2x16x256xf32>
    %cst_27 = arith.constant 8.99999984E-4 : f32
    %37 = vector.broadcast %cst_27 : f32 to vector<2x16x256xf32>
    %38 = arith.addf %36, %37 : vector<2x16x256xf32>
    %39 = arith.mulf %34, %38 : vector<2x16x256xf32>
    %40 = arith.addf %25, %26 : vector<2x16x256xf32>
    %cst_28 = arith.constant 9.99999974E-5 : f32
    %41 = vector.broadcast %cst_28 : f32 to vector<2x16x256xf32>
    %42 = arith.addf %40, %41 : vector<2x16x256xf32>
    %43 = arith.addf %28, %29 : vector<2x16x256xf32>
    %cst_29 = arith.constant 8.99999984E-4 : f32
    %44 = vector.broadcast %cst_29 : f32 to vector<2x16x256xf32>
    %45 = arith.addf %43, %44 : vector<2x16x256xf32>
    %46 = arith.mulf %42, %45 : vector<2x16x256xf32>
    %47 = arith.divf %39, %46 : vector<2x16x256xf32>
    %48 = vector.shape_cast %47 : vector<2x16x256xf32> to vector<1x2x16x256xf32>
    %cst_30 = arith.constant dense<0.000000e+00> : vector<1xf32>
    %49 = vector.multi_reduction <add>, %48, %cst_30 [1, 2, 3] : vector<1x2x16x256xf32> to vector<1xf32>
    %50 = vector.shape_cast %49 : vector<1xf32> to vector<1x1x1x1xf32>
    %51 = vector.extract %50[0, 0, 0, 0] : f32 from vector<1x1x1x1xf32>
    %52 = vector.broadcast %51 : f32 to vector<1x1x1xf32>
    %c0_31 = arith.constant 0 : index
    %c0_32 = arith.constant 0 : index
    %c0_33 = arith.constant 0 : index
    %53 = vector.load %arg5[%c0_31, %c0_32, %c0_33] : memref<1x1x1xf32, #tpu.memory_space<vmem>>, vector<1x1x1xf32>
    tpu.vector_store %arg5[%c0_31, %c0_32, %c0_33], %52 {strides = array<i32>} : memref<1x1x1xf32, #tpu.memory_space<vmem>>, vector<1x1x1xf32>,
    return
  }
  func.func @transform_0(%arg0: i32) -> (i32, i32) {
    %c0_i32 = arith.constant 0 : i32
    %c0_i32_0 = arith.constant 0 : i32
    %c0_i32_1 = arith.constant 0 : i32
    return %c0_i32, %c0_i32_0 : i32, i32
  }
  func.func @transform_1(%arg0: i32) -> (i32, i32) {
    %c0_i32 = arith.constant 0 : i32
    %c0_i32_0 = arith.constant 0 : i32
    %c0_i32_1 = arith.constant 0 : i32
    return %c0_i32, %c0_i32_0 : i32, i32
  }
  func.func @transform_2(%arg0: i32) -> (i32, i32, i32) {
    %c0_i32 = arith.constant 0 : i32
    %c0_i32_0 = arith.constant 0 : i32
    %c0_i32_1 = arith.constant 0 : i32
    return %arg0, %c0_i32, %c0_i32_0 : i32, i32, i32
  }
  func.func @transform_3(%arg0: i32) -> (i32, i32, i32) {
    %c0_i32 = arith.constant 0 : i32
    %c0_i32_0 = arith.constant 0 : i32
    %c0_i32_1 = arith.constant 0 : i32
    return %arg0, %c0_i32, %c0_i32_0 : i32, i32, i32
  }
  func.func @transform_4(%arg0: i32) -> (i32, i32, i32) {
    %c0_i32 = arith.constant 0 : i32
    %c0_i32_0 = arith.constant 0 : i32
    %c0_i32_1 = arith.constant 0 : i32
    return %arg0, %c0_i32, %c0_i32_0 : i32, i32, i32
  }
}

</mosaic_0001>

<bundles_post_ra>
// kernel: ssim3d.1
= control target key start
LH: loop header
LB: loop body
LE: loop exit
PB: predicated region body
PF: predicated region fallthrough
CT: control target
= control target key end

     0   :  { %s1875_s0 = inlined_call_operand.vmem [shape: f32[256,256], index: 0, kind: input, shape index: {}]   ;;  %s1876_s1 = inlined_call_operand.vmem [shape: f32[16,16], index: 1, kind: input, shape index: {}]   ;;  %s1877_s2 = inlined_call_operand.vmem [shape: f32[2,16,256], index: 2, kind: input, shape index: {}]   ;;  %s1878_s3 = inlined_call_operand.vmem [shape: f32[2,16,256], index: 3, kind: input, shape index: {}]   ;;  %s1879_s4 = inlined_call_operand.hbm [shape: f32[1,1,1], index: 4, kind: output, shape index: {}]  }
   0x1   :  { %v173_v0 = vld [vmem:[%s1875_s0 + $0xf8] sm:$0xff]  ;;  %v172_v1 = vld [vmem:[%s1875_s0 + $0xf0] sm:$0xff]  ;;  %v171_v2 = vld [vmem:[%s1875_s0 + $0xe8] sm:$0xff] }
   0x2   :  { %206 = vmatprep.subr.mxu0 %v173_v0  ;;  %v170_v3 = vld [vmem:[%s1875_s0 + $0xe0] sm:$0xff]  ;;  %v169_v4 = vld [vmem:[%s1875_s0 + $0xd8] sm:$0xff]  ;;  %v168_v5 = vld [vmem:[%s1875_s0 + $0xd0] sm:$0xff] }
   0x3   :  { %207 = vmatpush1.msra.mxu0 %v172_v1  ;;  %v167_v6 = vld [vmem:[%s1875_s0 + $0xc8] sm:$0xff]  ;;  %v166_v7 = vld [vmem:[%s1875_s0 + $0xc0] sm:$0xff]  ;;  %v165_v8 = vld [vmem:[%s1875_s0 + $0xb8] sm:$0xff] }
   0x4   :  { %208 = vmatprep.subr.mxu0 %v171_v2  ;;  %v164_v9 = vld [vmem:[%s1875_s0 + $0xb0] sm:$0xff]  ;;  %v163_v10 = vld [vmem:[%s1875_s0 + $0xa8] sm:$0xff]  ;;  %v162_v11 = vld [vmem:[%s1875_s0 + $0xa0] sm:$0xff] }
   0x5   :  { %209 = vmatpush1.msra.mxu0 %v170_v3  ;;  %v161_v12 = vld [vmem:[%s1875_s0 + $0x98] sm:$0xff]  ;;  %v160_v13 = vld [vmem:[%s1875_s0 + $0x90] sm:$0xff]  ;;  %v159_v14 = vld [vmem:[%s1875_s0 + $0x88] sm:$0xff] }
   0x6   :  { %210 = vmatprep.subr.mxu0 %v169_v4  ;;  %v158_v15 = vld [vmem:[%s1875_s0 + $0x80] sm:$0xff]  ;;  %v157_v16 = vld [vmem:[%s1875_s0 + $0x78] sm:$0xff]  ;;  %v156_v17 = vld [vmem:[%s1875_s0 + $0x70] sm:$0xff] }
   0x7   :  { %211 = vmatpush1.msra.mxu0 %v168_v5  ;;  %v155_v18 = vld [vmem:[%s1875_s0 + $0x68] sm:$0xff]  ;;  %v154_v19 = vld [vmem:[%s1875_s0 + $0x60] sm:$0xff]  ;;  %v153_v20 = vld [vmem:[%s1875_s0 + $0x58] sm:$0xff] }
   0x8   :  { %212 = vmatprep.subr.mxu0 %v167_v6  ;;  %v152_v21 = vld [vmem:[%s1875_s0 + $0x50] sm:$0xff]  ;;  %v151_v22 = vld [vmem:[%s1875_s0 + $0x48] sm:$0xff]  ;;  %v150_v23 = vld [vmem:[%s1875_s0 + $0x40] sm:$0xff] }
   0x9   :  { %213 = vmatpush1.msra.mxu0 %v166_v7  ;;  %v1511_v24 = vld [vmem:[%s1877_s2 + $0x8] sm:$0xff]  ;;  %v149_v25 = vld [vmem:[%s1875_s0 + $0x38] sm:$0xff]  ;;  %v148_v26 = vld [vmem:[%s1875_s0 + $0x30] sm:$0xff] }
   0xa   :  { %214 = vmatprep.subr.mxu0 %v165_v8  ;;  %270 = vmatprep.mubr.f32.mxu0 %v1511_v24  ;;  %v147_v27 = vld [vmem:[%s1875_s0 + $0x28] sm:$0xff]  ;;  %v146_v28 = vld [vmem:[%s1875_s0 + $0x20] sm:$0xff]  ;;  %v145_v29 = vld [vmem:[%s1875_s0 + $0x18] sm:$0xff] }
   0xb   :  { %215 = vmatpush1.msra.mxu0 %v164_v9 }
   0xc   :  { %216 = vmatprep.subr.mxu0 %v163_v10 }
   0xd   :  { %217 = vmatpush1.msra.mxu0 %v162_v11 }
   0xe   :  { %218 = vmatprep.subr.mxu0 %v161_v12 }
   0xf   :  { %219 = vmatpush1.msra.mxu0 %v160_v13 }
  0x10   :  { %220 = vmatprep.subr.mxu0 %v159_v14 }
  0x11   :  { %221 = vmatpush1.msra.mxu0 %v158_v15 }
  0x12   :  { %222 = vmatprep.subr.mxu0 %v157_v16 }
  0x13   :  { %223 = vmatpush1.msra.mxu0 %v156_v17 }
  0x14   :  { %224 = vmatprep.subr.mxu0 %v155_v18 }
  0x15   :  { %225 = vmatpush1.msra.mxu0 %v154_v19 }
  0x16   :  { %226 = vmatprep.subr.mxu0 %v153_v20 }
  0x17   :  { %227 = vmatpush1.msra.mxu0 %v152_v21 }
  0x18   :  { %228 = vmatprep.subr.mxu0 %v151_v22 }
  0x19   :  { %229 = vmatpush1.msra.mxu0 %v150_v23 }
  0x1a   :  { %230 = vmatprep.subr.mxu0 %v149_v25 }
  0x1b   :  { %231 = vmatpush1.msra.mxu0 %v148_v26 }
  0x1c   :  { %9 = vsyncpa [#allocation4], 0  ;;  %232 = vmatprep.subr.mxu0 %v147_v27  ;;  %v144_v30 = vld [vmem:[%s1875_s0 + $0x10] sm:$0xff]  ;;  %v143_v31 = vld [vmem:[%s1875_s0 + $0x8] sm:$0xff]  ;;  %v52_v16 = vmul.f32 %v1511_v24, %v1511_v24  ;;  %vm393_vm0 = vcmask 130048   ;;  %vm1331_vm1 = vcmask 0  }
  0x1d   :  { %233 = vmatpush1.msra.mxu0 %v146_v28  ;;  %v142_v32 = vld [vmem:[%s1875_s0] sm:$0xff]  ;;  %v205_v33 = vld [vmem:[%s1875_s0 + $0x1f8] sm:$0xff]  ;;  %v204_v34 = vld [vmem:[%s1875_s0 + $0x1f0] sm:$0xff] }
  0x1e   :  { %234 = vmatprep.subr.mxu0 %v145_v29  ;;  %v203_v35 = vld [vmem:[%s1875_s0 + $0x1e8] sm:$0xff]  ;;  %v202_v36 = vld [vmem:[%s1875_s0 + $0x1e0] sm:$0xff]  ;;  %v201_v37 = vld [vmem:[%s1875_s0 + $0x1d8] sm:$0xff] }
  0x1f   :  { %235 = vmatpush1.msra.mxu0 %v144_v30  ;;  %v200_v38 = vld [vmem:[%s1875_s0 + $0x1d0] sm:$0xff]  ;;  %v199_v39 = vld [vmem:[%s1875_s0 + $0x1c8] sm:$0xff]  ;;  %v198_v40 = vld [vmem:[%s1875_s0 + $0x1c0] sm:$0xff] }
  0x20   :  { %236 = vmatprep.subr.mxu0 %v143_v31  ;;  %v197_v41 = vld [vmem:[%s1875_s0 + $0x1b8] sm:$0xff]  ;;  %v196_v42 = vld [vmem:[%s1875_s0 + $0x1b0] sm:$0xff]  ;;  %v195_v43 = vld [vmem:[%s1875_s0 + $0x1a8] sm:$0xff] }
  0x21   :  { %237 = vmatpush1.msra.mxu0 %v142_v32  ;;  %v194_v44 = vld [vmem:[%s1875_s0 + $0x1a0] sm:$0xff]  ;;  %v193_v45 = vld [vmem:[%s1875_s0 + $0x198] sm:$0xff]  ;;  %v192_v46 = vld [vmem:[%s1875_s0 + $0x190] sm:$0xff] }
  0x22   :  { %238 = vmatprep.subr.mxu0 %v205_v33  ;;  %v191_v47 = vld [vmem:[%s1875_s0 + $0x188] sm:$0xff]  ;;  %v190_v48 = vld [vmem:[%s1875_s0 + $0x180] sm:$0xff]  ;;  %v189_v49 = vld [vmem:[%s1875_s0 + $0x178] sm:$0xff] }
  0x23   :  { %239 = vmatpush2.msra.mxu0 %v204_v34  ;;  %v188_v50 = vld [vmem:[%s1875_s0 + $0x170] sm:$0xff]  ;;  %v187_v51 = vld [vmem:[%s1875_s0 + $0x168] sm:$0xff]  ;;  %v186_v52 = vld [vmem:[%s1875_s0 + $0x160] sm:$0xff] }
  0x24   :  { %240 = vmatprep.subr.mxu0 %v203_v35  ;;  %v185_v53 = vld [vmem:[%s1875_s0 + $0x158] sm:$0xff]  ;;  %v184_v54 = vld [vmem:[%s1875_s0 + $0x150] sm:$0xff]  ;;  %v183_v55 = vld [vmem:[%s1875_s0 + $0x148] sm:$0xff] }
  0x25   :  { %241 = vmatpush2.msra.mxu0 %v202_v36  ;;  %v182_v56 = vld [vmem:[%s1875_s0 + $0x140] sm:$0xff]  ;;  %v181_v57 = vld [vmem:[%s1875_s0 + $0x138] sm:$0xff]  ;;  %v180_v58 = vld [vmem:[%s1875_s0 + $0x130] sm:$0xff] }
  0x26   :  { %242 = vmatprep.subr.mxu0 %v201_v37  ;;  %v179_v59 = vld [vmem:[%s1875_s0 + $0x128] sm:$0xff]  ;;  %v178_v60 = vld [vmem:[%s1875_s0 + $0x120] sm:$0xff]  ;;  %v177_v61 = vld [vmem:[%s1875_s0 + $0x118] sm:$0xff] }
  0x27   :  { %243 = vmatpush2.msra.mxu0 %v200_v38  ;;  %v176_v62 = vld [vmem:[%s1875_s0 + $0x110] sm:$0xff]  ;;  %v175_v63 = vld [vmem:[%s1875_s0 + $0x108] sm:$0xff]  ;;  %v174_v0 = vld [vmem:[%s1875_s0 + $0x100] sm:$0xff] }
  0x28   :  { %244 = vmatprep.subr.mxu0 %v199_v39  ;;  %v1637_v1 = vld [vmem:[%s1877_s2] sm:$0xff]  ;;  %v1642_v2 = vld [vmem:[%s1877_s2 + $0x18] sm:$0xff]  ;;  %v1649_v3 = vld [vmem:[%s1877_s2 + $0x10] sm:$0xff] }
  0x29   :  { %245 = vmatpush2.msra.mxu0 %v198_v40  ;;  %v1654_v4 = vld [vmem:[%s1877_s2 + $0x28] sm:$0xff]  ;;  %v1661_v5 = vld [vmem:[%s1877_s2 + $0x20] sm:$0xff]  ;;  %v1666_v6 = vld [vmem:[%s1877_s2 + $0x38] sm:$0xff]  ;;  %v51_v17 = vmul.f32 %v1637_v1, %v1637_v1  ;;  %v54_v18 = vmul.f32 %v1642_v2, %v1642_v2  ;;  %v53_v19 = vmul.f32 %v1649_v3, %v1649_v3  ;;  %v1409_v40 = vmov 0.0  }
  0x2a   :  { %246 = vmatprep.subr.mxu0 %v197_v41  ;;  %v1673_v7 = vld [vmem:[%s1877_s2 + $0x30] sm:$0xff]  ;;  %v27_v8 = vld [vmem:[%s1878_s3 + $0x8] sm:$0xff]  ;;  %v26_v9 = vld [vmem:[%s1878_s3] sm:$0xff]  ;;  %v56_v20 = vmul.f32 %v1654_v4, %v1654_v4  ;;  %v55_v21 = vmul.f32 %v1661_v5, %v1661_v5  ;;  %v58_v22 = vmul.f32 %v1666_v6, %v1666_v6  ;;  %464 = vmatprep.mubr.f32.mxu1 %v1409_v40 }
  0x2b   :  { %247 = vmatpush2.msra.mxu0 %v196_v42  ;;  %v29_v10 = vld [vmem:[%s1878_s3 + $0x18] sm:$0xff]  ;;  %v28_v11 = vld [vmem:[%s1878_s3 + $0x10] sm:$0xff]  ;;  %v31_v12 = vld [vmem:[%s1878_s3 + $0x28] sm:$0xff]  ;;  %v57_v23 = vmul.f32 %v1673_v7, %v1673_v7  ;;  %v69_v25 = vmul.f32 %v27_v8, %v27_v8  ;;  %v68_v26 = vmul.f32 %v26_v9, %v26_v9  ;;  %v86_v33 = vmul.f32 %v27_v8, %v1511_v24 }
  0x2c   :  { %248 = vmatprep.subr.mxu0 %v195_v43  ;;  %v30_v13 = vld [vmem:[%s1878_s3 + $0x20] sm:$0xff]  ;;  %v33_v14 = vld [vmem:[%s1878_s3 + $0x38] sm:$0xff]  ;;  %v32_v15 = vld [vmem:[%s1878_s3 + $0x30] sm:$0xff]  ;;  %v71_v27 = vmul.f32 %v29_v10, %v29_v10  ;;  %v70_v28 = vmul.f32 %v28_v11, %v28_v11  ;;  %v73_v29 = vmul.f32 %v31_v12, %v31_v12  ;;  %v85_v34 = vmul.f32 %v26_v9, %v1637_v1 }
  0x2d   :  { %249 = vmatpush2.msra.mxu0 %v194_v44  ;;  %v72_v30 = vmul.f32 %v30_v13, %v30_v13  ;;  %v75_v31 = vmul.f32 %v33_v14, %v33_v14  ;;  %v74_v32 = vmul.f32 %v32_v15, %v32_v15  ;;  %v88_v35 = vmul.f32 %v29_v10, %v1642_v2 }
  0x2e   :  { %250 = vmatprep.subr.mxu0 %v193_v45  ;;  %v87_v36 = vmul.f32 %v28_v11, %v1649_v3  ;;  %v90_v37 = vmul.f32 %v31_v12, %v1654_v4  ;;  %v89_v38 = vmul.f32 %v30_v13, %v1661_v5  ;;  %v92_v39 = vmul.f32 %v33_v14, %v1666_v6 }
  0x2f   :  { %251 = vmatpush2.msra.mxu0 %v192_v46  ;;  %v91_v24 = vmul.f32 %v32_v15, %v1673_v7  ;;  %v1728_v46 = vld [vmem:[%s1876_s1] sm:$0xff] }
  0x30   :  { %252 = vmatprep.subr.mxu0 %v191_v47 }
  0x31   :  { %253 = vmatpush2.msra.mxu0 %v190_v48 }
  0x32   :  { %254 = vmatprep.subr.mxu0 %v189_v49  ;;  %v1736_v49 = vld [vmem:[%s1876_s1 + $0x8] sm:$0xff]  ;;  %s1410_s1 = smov [#allocation3]  }
  0x33   :  { %255 = vmatpush2.msra.mxu0 %v188_v50  ;;  %s1339_s20 = sshll.u32 %s1410_s1, 4  ;;  %s1340_s20 = int_to_ptr.vmem [resolvable:$true] %s1339_s20 }
  0x34   :  { %256 = vmatprep.subr.mxu0 %v187_v51  ;;  %s1387_s21 = scalar_lea.vmem %s1340_s20, 16  ;;  %s1391_s22 = scalar_lea.vmem %s1340_s20, 32 }
  0x35   :  { %257 = vmatpush2.msra.mxu0 %v186_v52  ;;  %p1388_p0 = scmp.ne.s32.totalorder %s1340_s20, %s1387_s21  ;;  %p1392_p1 = scmp.lt.s32.totalorder %s1340_s20, %s1340_s20 }
  0x36   :  { %258 = vmatprep.subr.mxu0 %v185_v53  ;;  %p1393_p2 = scmp.lt.s32.totalorder %s1391_s22, %s1387_s21 }
  0x37   :  { %259 = vmatpush2.msra.mxu0 %v184_v54 }
  0x38   :  { %260 = vmatprep.subr.mxu0 %v183_v55  ;;  %p1394_p3 = por %p1393_p2, %p1392_p1 }
  0x39   :  { %261 = vmatpush2.msra.mxu0 %v182_v56 }
  0x3a   :  { %262 = vmatprep.subr.mxu0 %v181_v57  ;;  %p1395_p4 = pnand %p1394_p3, %p1388_p0 }
  0x3b   :  { %263 = vmatpush2.msra.mxu0 %v180_v58 }
  0x3c   :  { %264 = vmatprep.subr.mxu0 %v179_v59 }
  0x3d   :  { %265 = vmatpush2.msra.mxu0 %v178_v60 }
  0x3e   :  { %266 = vmatprep.subr.mxu0 %v177_v61 }
  0x3f   :  { %267 = vmatpush2.msra.mxu0 %v176_v62 }
  0x40   :  { %268 = vmatprep.subr.mxu0 %v175_v63 }
  0x41   :  { %269 = vmatpush2.msra.mxu0 %v174_v0 }
  0x42   :  { %271 = vmatmul.mubr.f32.vlgmr.msra.gmra.mxu0 %v1637_v1 }
  0x43   :  { %276 = vmatprep.mubr.f32.mxu0 %v1642_v2 }
  0x46   :  { %277 = vmatmul.mubr.f32.gmra.mxu0 %v1649_v3 }
  0x47   :  { %282 = vmatprep.mubr.f32.mxu0 %v1654_v4 }
  0x4a   :  { %283 = vmatmul.mubr.f32.gmra.mxu0 %v1661_v5 }
  0x4b   :  { %288 = vmatprep.mubr.f32.mxu0 %v1666_v6 }
  0x4e   :  { %289 = vmatmul.mubr.f32.gmra.mxu0 %v1673_v7 }
  0x4f   :  { %294 = vmatprep.mubr.f32.mxu0 %v27_v8 }
  0x52   :  { %295 = vmatmul.mubr.f32.gmra.mxu0 %v26_v9 }
  0x53   :  { %300 = vmatprep.mubr.f32.mxu0 %v29_v10 }
  0x56   :  { %301 = vmatmul.mubr.f32.gmra.mxu0 %v28_v11 }
  0x57   :  { %306 = vmatprep.mubr.f32.mxu0 %v31_v12 }
  0x5a   :  { %307 = vmatmul.mubr.f32.gmra.mxu0 %v30_v13 }
  0x5b   :  { %312 = vmatprep.mubr.f32.mxu0 %v33_v14 }
  0x5e   :  { %313 = vmatmul.mubr.f32.gmra.mxu0 %v32_v15 }
  0x5f   :  { %318 = vmatprep.mubr.f32.mxu0 %v52_v16 }
  0x62   :  { %319 = vmatmul.mubr.f32.gmra.mxu0 %v51_v17 }
  0x63   :  { %324 = vmatprep.mubr.f32.mxu0 %v54_v18 }
  0x66   :  { %325 = vmatmul.mubr.f32.gmra.mxu0 %v53_v19 }
  0x67   :  { %330 = vmatprep.mubr.f32.mxu0 %v56_v20 }
  0x6a   :  { %331 = vmatmul.mubr.f32.gmra.mxu0 %v55_v21 }
  0x6b   :  { %336 = vmatprep.mubr.f32.mxu0 %v58_v22 }
  0x6e   :  { %337 = vmatmul.mubr.f32.gmra.mxu0 %v57_v23 }
  0x6f   :  { %342 = vmatprep.mubr.f32.mxu0 %v69_v25 }
  0x72   :  { %343 = vmatmul.mubr.f32.gmra.mxu0 %v68_v26 }
  0x73   :  { %348 = vmatprep.mubr.f32.mxu0 %v71_v27 }
  0x76   :  { %349 = vmatmul.mubr.f32.gmra.mxu0 %v70_v28 }
  0x77   :  { %354 = vmatprep.mubr.f32.mxu0 %v73_v29 }
  0x7a   :  { %355 = vmatmul.mubr.f32.gmra.mxu0 %v72_v30 }
  0x7b   :  { %360 = vmatprep.mubr.f32.mxu0 %v75_v31 }
  0x7e   :  { %361 = vmatmul.mubr.f32.gmra.mxu0 %v74_v32 }
  0x7f   :  { %366 = vmatprep.mubr.f32.mxu0 %v86_v33 }
  0x82   :  { %367 = vmatmul.mubr.f32.gmra.mxu0 %v85_v34 }
  0x83   :  { %372 = vmatprep.mubr.f32.mxu0 %v88_v35 }
  0x86   :  { %373 = vmatmul.mubr.f32.gmra.mxu0 %v87_v36 }
  0x87   :  { %378 = vmatprep.mubr.f32.mxu0 %v90_v37 }
  0x8a   :  { %379 = vmatmul.mubr.f32.gmra.mxu0 %v89_v38 }
  0x8b   :  { %384 = vmatprep.mubr.f32.mxu0 %v92_v39 }
  0x8e   :  { %385 = vmatmul.mubr.f32.gmra.mxu0 %v91_v24 }
 0x102   :  { %v272_v41 = vpop.f32.mrf.mxu0 }
 0x104   :  { %v274_v42 = vpop.f32.mrf.mxu0 }
 0x106   :  { %v278_v43 = vpop.f32.mrf.mxu0 }
 0x108   :  { %v280_v44 = vpop.f32.mrf.mxu0 }
 0x109   :  { %428 = vmatprep.subr.mxu1 %v280_v44 }
 0x10a   :  { %v284_v45 = vpop.f32.mrf.mxu0  ;;  %429 = vmatpush1.msra.mxu1 %v278_v43 }
 0x10b   :  { %430 = vmatprep.subr.mxu1 %v274_v42 }
 0x10c   :  { %v286_v47 = vpop.f32.mrf.mxu0  ;;  %431 = vmatpush1.msra.mxu1 %v272_v41 }
 0x10d   :  { %1347 = vmatmul.mubr.msk.f32.vlgmr.msra.gmra.mxu1 %vm393_vm0, %v1728_v46 }
 0x10e   :  { %v290_v48 = vpop.f32.mrf.mxu0  ;;  %470 = vmatprep.mubr.f32.mxu1 %v1409_v40 }
 0x110   :  { %v292_v50 = vpop.f32.mrf.mxu0 }
 0x111   :  { %1348 = vmatmul.mubr.msk.f32.gmra.mxu1 %vm393_vm0, %v1736_v49  ;;  %505 = vmatprep.subr.mxu1 %v292_v50 }
 0x112   :  { %v296_v51 = vpop.f32.mrf.mxu0  ;;  %506 = vmatpush1.msra.mxu1 %v290_v48  ;;  %541 = vmatprep.mubr.f32.mxu1 %v1409_v40 }
 0x113   :  { %507 = vmatprep.subr.mxu1 %v286_v47 }
 0x114   :  { %v298_v52 = vpop.f32.mrf.mxu0  ;;  %508 = vmatpush1.msra.mxu1 %v284_v45 }
 0x115   :  { %1349 = vmatmul.mubr.msk.f32.vlgmr.msra.gmra.mxu1 %vm393_vm0, %v1728_v46 }
 0x116   :  { %v302_v53 = vpop.f32.mrf.mxu0  ;;  %547 = vmatprep.mubr.f32.mxu1 %v1409_v40 }
 0x118   :  { %v304_v54 = vpop.f32.mrf.mxu0 }
 0x119   :  { %1350 = vmatmul.mubr.msk.f32.gmra.mxu1 %vm393_vm0, %v1736_v49  ;;  %582 = vmatprep.subr.mxu1 %v304_v54 }
 0x11a   :  { %v308_v55 = vpop.f32.mrf.mxu0  ;;  %583 = vmatpush1.msra.mxu1 %v302_v53  ;;  %618 = vmatprep.mubr.f32.mxu1 %v1409_v40 }
 0x11b   :  { %584 = vmatprep.subr.mxu1 %v298_v52 }
 0x11c   :  { %v310_v56 = vpop.f32.mrf.mxu0  ;;  %585 = vmatpush1.msra.mxu1 %v296_v51 }
 0x11d   :  { %1351 = vmatmul.mubr.msk.f32.vlgmr.msra.gmra.mxu1 %vm393_vm0, %v1728_v46 }
 0x11e   :  { %v314_v57 = vpop.f32.mrf.mxu0  ;;  %624 = vmatprep.mubr.f32.mxu1 %v1409_v40 }
 0x120   :  { %v316_v58 = vpop.f32.mrf.mxu0 }
 0x121   :  { %1352 = vmatmul.mubr.msk.f32.gmra.mxu1 %vm393_vm0, %v1736_v49  ;;  %659 = vmatprep.subr.mxu1 %v316_v58 }
 0x122   :  { %v320_v59 = vpop.f32.mrf.mxu0  ;;  %660 = vmatpush1.msra.mxu1 %v314_v57  ;;  %695 = vmatprep.mubr.f32.mxu1 %v1409_v40 }
 0x123   :  { %661 = vmatprep.subr.mxu1 %v310_v56 }
 0x124   :  { %v322_v60 = vpop.f32.mrf.mxu0  ;;  %662 = vmatpush1.msra.mxu1 %v308_v55 }
 0x125   :  { %1353 = vmatmul.mubr.msk.f32.vlgmr.msra.gmra.mxu1 %vm393_vm0, %v1728_v46 }
 0x126   :  { %v326_v61 = vpop.f32.mrf.mxu0  ;;  %701 = vmatprep.mubr.f32.mxu1 %v1409_v40 }
 0x128   :  { %v328_v62 = vpop.f32.mrf.mxu0 }
 0x129   :  { %1354 = vmatmul.mubr.msk.f32.gmra.mxu1 %vm393_vm0, %v1736_v49  ;;  %736 = vmatprep.subr.mxu1 %v328_v62 }
 0x12a   :  { %v332_v63 = vpop.f32.mrf.mxu0  ;;  %737 = vmatpush1.msra.mxu1 %v326_v61  ;;  %772 = vmatprep.mubr.f32.mxu1 %v1409_v40 }
 0x12b   :  { %738 = vmatprep.subr.mxu1 %v322_v60 }
 0x12c   :  { %v334_v0 = vpop.f32.mrf.mxu0  ;;  %739 = vmatpush1.msra.mxu1 %v320_v59 }
 0x12d   :  { %1355 = vmatmul.mubr.msk.f32.vlgmr.msra.gmra.mxu1 %vm393_vm0, %v1728_v46 }
 0x12e   :  { %v338_v1 = vpop.f32.mrf.mxu0  ;;  %778 = vmatprep.mubr.f32.mxu1 %v1409_v40 }
 0x130   :  { %v340_v2 = vpop.f32.mrf.mxu0 }
 0x131   :  { %1356 = vmatmul.mubr.msk.f32.gmra.mxu1 %vm393_vm0, %v1736_v49  ;;  %813 = vmatprep.subr.mxu1 %v340_v2 }
 0x132   :  { %v344_v3 = vpop.f32.mrf.mxu0  ;;  %814 = vmatpush1.msra.mxu1 %v338_v1  ;;  %849 = vmatprep.mubr.f32.mxu1 %v1409_v40 }
 0x133   :  { %815 = vmatprep.subr.mxu1 %v334_v0 }
 0x134   :  { %v346_v4 = vpop.f32.mrf.mxu0  ;;  %816 = vmatpush1.msra.mxu1 %v332_v63 }
 0x135   :  { %1357 = vmatmul.mubr.msk.f32.vlgmr.msra.gmra.mxu1 %vm393_vm0, %v1728_v46 }
 0x136   :  { %v350_v5 = vpop.f32.mrf.mxu0  ;;  %855 = vmatprep.mubr.f32.mxu1 %v1409_v40 }
 0x138   :  { %v352_v6 = vpop.f32.mrf.mxu0 }
 0x139   :  { %1358 = vmatmul.mubr.msk.f32.gmra.mxu1 %vm393_vm0, %v1736_v49  ;;  %890 = vmatprep.subr.mxu1 %v352_v6 }
 0x13a   :  { %v356_v7 = vpop.f32.mrf.mxu0  ;;  %891 = vmatpush1.msra.mxu1 %v350_v5  ;;  %926 = vmatprep.mubr.f32.mxu1 %v1409_v40 }
 0x13b   :  { %892 = vmatprep.subr.mxu1 %v346_v4 }
 0x13c   :  { %v358_v8 = vpop.f32.mrf.mxu0  ;;  %893 = vmatpush1.msra.mxu1 %v344_v3 }
 0x13d   :  { %1359 = vmatmul.mubr.msk.f32.vlgmr.msra.gmra.mxu1 %vm393_vm0, %v1728_v46 }
 0x13e   :  { %v362_v9 = vpop.f32.mrf.mxu0  ;;  %932 = vmatprep.mubr.f32.mxu1 %v1409_v40 }
 0x140   :  { %v364_v10 = vpop.f32.mrf.mxu0 }
 0x141   :  { %1360 = vmatmul.mubr.msk.f32.gmra.mxu1 %vm393_vm0, %v1736_v49  ;;  %967 = vmatprep.subr.mxu1 %v364_v10 }
 0x142   :  { %v368_v11 = vpop.f32.mrf.mxu0  ;;  %968 = vmatpush1.msra.mxu1 %v362_v9  ;;  %1003 = vmatprep.mubr.f32.mxu1 %v1409_v40 }
 0x143   :  { %969 = vmatprep.subr.mxu1 %v358_v8 }
 0x144   :  { %v370_v12 = vpop.f32.mrf.mxu0  ;;  %970 = vmatpush1.msra.mxu1 %v356_v7 }
 0x145   :  { %1361 = vmatmul.mubr.msk.f32.vlgmr.msra.gmra.mxu1 %vm393_vm0, %v1728_v46 }
 0x146   :  { %v374_v13 = vpop.f32.mrf.mxu0  ;;  %1009 = vmatprep.mubr.f32.mxu1 %v1409_v40 }
 0x148   :  { %v376_v14 = vpop.f32.mrf.mxu0 }
 0x149   :  { %1362 = vmatmul.mubr.msk.f32.gmra.mxu1 %vm393_vm0, %v1736_v49  ;;  %1044 = vmatprep.subr.mxu1 %v376_v14 }
 0x14a   :  { %v380_v15 = vpop.f32.mrf.mxu0  ;;  %1045 = vmatpush1.msra.mxu1 %v374_v13  ;;  %1080 = vmatprep.mubr.f32.mxu1 %v1409_v40 }
 0x14b   :  { %1046 = vmatprep.subr.mxu1 %v370_v12 }
 0x14c   :  { %v382_v16 = vpop.f32.mrf.mxu0  ;;  %1047 = vmatpush1.msra.mxu1 %v368_v11 }
 0x14d   :  { %1363 = vmatmul.mubr.msk.f32.vlgmr.msra.gmra.mxu1 %vm393_vm0, %v1728_v46 }
 0x14e   :  { %v386_v17 = vpop.f32.mrf.mxu0  ;;  %1086 = vmatprep.mubr.f32.mxu1 %v1409_v40 }
 0x150   :  { %v388_v18 = vpop.f32.mrf.mxu0 }
 0x151   :  { %1364 = vmatmul.mubr.msk.f32.gmra.mxu1 %vm393_vm0, %v1736_v49  ;;  %1121 = vmatprep.subr.mxu1 %v388_v18 }
 0x152   :  { %1122 = vmatpush1.msra.mxu1 %v386_v17  ;;  %1157 = vmatprep.mubr.f32.mxu1 %v1409_v40 }
 0x153   :  { %1123 = vmatprep.subr.mxu1 %v382_v16 }
 0x154   :  { %1124 = vmatpush1.msra.mxu1 %v380_v15 }
 0x155   :  { %1365 = vmatmul.mubr.msk.f32.vlgmr.msra.gmra.mxu1 %vm393_vm0, %v1728_v46 }
 0x156   :  { %1163 = vmatprep.mubr.f32.mxu1 %v1409_v40 }
 0x159   :  { %1366 = vmatmul.mubr.msk.f32.gmra.mxu1 %vm393_vm0, %v1736_v49 }
 0x1cd   :  { %v466_v19 = vpop.f32.mrf.mxu1 }
 0x1ce   :  { %v1170_v45 = vmul.f32 %v466_v19, %v466_v19 }
 0x1cf   :  { %v468_v20 = vpop.f32.mrf.mxu1 }
 0x1d0   :  { %v1171_v46 = vmul.f32 %v468_v20, %v468_v20 }
 0x1d1   :  { %v472_v21 = vpop.f32.mrf.mxu1 }
 0x1d2   :  { %v1172_v47 = vmul.f32 %v472_v21, %v472_v21 }
 0x1d3   :  { %v1794_v22 = vpop.f32.mrf.mxu1 }
 0x1d4   :  { %v1173_v48 = vmul.f32 %v1794_v22, %v1794_v22 }
 0x1d5   :  { %v1796_v23 = vpop.f32.mrf.mxu1 }
 0x1d6   :  { %v1174_v53 = vmul.f32 %v1796_v23, %v1796_v23 }
 0x1d7   :  { %v1798_v25 = vpop.f32.mrf.mxu1 }
 0x1d8   :  { %v1175_v54 = vmul.f32 %v1798_v25, %v1798_v25 }
 0x1d9   :  { %v1800_v26 = vpop.f32.mrf.mxu1 }
 0x1da   :  { %v1176_v57 = vmul.f32 %v1800_v26, %v1800_v26 }
 0x1db   :  { %v1802_v27 = vpop.f32.mrf.mxu1 }
 0x1dc   :  { %v1836_v58 = vmul.f32 %v1802_v27, %v1802_v27 }
 0x1dd   :  { %v620_v28 = vpop.f32.mrf.mxu1 }
 0x1de   :  { %v1178_v42 = vmul.f32 %v620_v28, %v620_v28  ;;  %v1838_v62 = vmul.f32 %v620_v28, %v466_v19 }
 0x1df   :  { %v622_v29 = vpop.f32.mrf.mxu1 }
 0x1e0   :  { %v1179_v43 = vmul.f32 %v622_v29, %v622_v29  ;;  %v1258_v59 = vadd.f32 %v1178_v42, %v1170_v45  ;;  %v1842_v12 = vmul.f32 %v622_v29, %v468_v20 }
 0x1e1   :  { %v626_v30 = vpop.f32.mrf.mxu1 }
 0x1e2   :  { %v1180_v49 = vmul.f32 %v626_v30, %v626_v30  ;;  %v1259_v60 = vadd.f32 %v1179_v43, %v1171_v46  ;;  %v1266_v11 = vadd.f32 0.0001, %v1258_v59  ;;  %v1844_v14 = vmul.f32 %v626_v30, %v472_v21 }
 0x1e3   :  { %v1804_v31 = vpop.f32.mrf.mxu1 }
 0x1e4   :  { %v1181_v50 = vmul.f32 %v1804_v31, %v1804_v31  ;;  %v1260_v2 = vadd.f32 %v1180_v49, %v1172_v47  ;;  %v1267_v13 = vadd.f32 0.0001, %v1259_v60 }
 0x1e5   :  { %v1806_v32 = vpop.f32.mrf.mxu1 }
 0x1e6   :  { %v1182_v51 = vmul.f32 %v1806_v32, %v1806_v32  ;;  %v1261_v3 = vadd.f32 %v1181_v50, %v1173_v48  ;;  %v1268_v28 = vadd.f32 0.0001, %v1260_v2 }
 0x1e7   :  { %v1808_v33 = vpop.f32.mrf.mxu1 }
 0x1e8   :  { %v1262_v4 = vadd.f32 %v1182_v51, %v1174_v53  ;;  %v1183_v5 = vmul.f32 %v1808_v33, %v1808_v33 }
 0x1e9   :  { %v1810_v34 = vpop.f32.mrf.mxu1 }
 0x1eb   :  { %v1812_v35 = vpop.f32.mrf.mxu1 }
 0x1ec   :  { %v1185_v21 = vmul.f32 %v1812_v35, %v1812_v35 }
 0x1ed   :  { %v774_v36 = vpop.f32.mrf.mxu1 }
 0x1ee   :  { %v1194_v55 = vsub.f32 %v774_v36, %v1170_v45  ;;  %v1269_v36 = vadd.f32 0.0001, %v1261_v3 }
 0x1ef   :  { %v776_v37 = vpop.f32.mrf.mxu1 }
 0x1f0   :  { %v1195_v63 = vsub.f32 %v776_v37, %v1171_v46  ;;  %v1263_v37 = vadd.f32 %v1183_v5, %v1175_v54 }
 0x1f1   :  { %v780_v38 = vpop.f32.mrf.mxu1 }
 0x1f2   :  { %v1196_v7 = vsub.f32 %v780_v38, %v1172_v47  ;;  %v1184_v38 = vmul.f32 %v1810_v34, %v1810_v34 }
 0x1f3   :  { %v782_v39 = vpop.f32.mrf.mxu1 }
 0x1f4   :  { %v1197_v16 = vsub.f32 %v782_v39, %v1173_v48 }
 0x1f5   :  { %v1814_v24 = vpop.f32.mrf.mxu1 }
 0x1f6   :  { %v1198_v29 = vsub.f32 %v1814_v24, %v1174_v53  ;;  %v1265_v24 = vadd.f32 %v1185_v21, %v1836_v58 }
 0x1f7   :  { %v1816_v40 = vpop.f32.mrf.mxu1 }
 0x1f8   :  { %v1199_v48 = vsub.f32 %v1816_v40, %v1175_v54 }
 0x1f9   :  { %v1818_v41 = vpop.f32.mrf.mxu1 }
 0x1fa   :  { %v1200_v59 = vsub.f32 %v1818_v41, %v1176_v57  ;;  %v1218_v41 = vmul.f32 2.0, %v1838_v62 }
 0x1fb   :  { %v1820_v44 = vpop.f32.mrf.mxu1 }
 0x1fd   :  { %v928_v52 = vpop.f32.mrf.mxu1 }
 0x1fe   :  { %v1202_v56 = vsub.f32 %v928_v52, %v1178_v42 }
 0x1ff   :  { %v930_v61 = vpop.f32.mrf.mxu1 }
 0x200   :  { %v1274_v0 = vadd.f32 %v1202_v56, %v1194_v55  ;;  %v1203_v1 = vsub.f32 %v930_v61, %v1179_v43  ;;  %v1270_v43 = vadd.f32 0.0001, %v1262_v4  ;;  %v1271_v55 = vadd.f32 0.0001, %v1263_v37 }
 0x201   :  { %v934_v6 = vpop.f32.mrf.mxu1  ;;  %v1264_v56 = vadd.f32 %v1184_v38, %v1176_v57  ;;  %v1219_v57 = vmul.f32 2.0, %v1842_v12 }
 0x202   :  { %v1282_v8 = vadd.f32 0.0009, %v1274_v0  ;;  %v1275_v9 = vadd.f32 %v1203_v1, %v1195_v63  ;;  %v1204_v10 = vsub.f32 %v934_v6, %v1180_v49 }
 0x203   :  { %v936_v15 = vpop.f32.mrf.mxu1 }
 0x204   :  { %v1283_v17 = vadd.f32 0.0009, %v1275_v9  ;;  %v1276_v18 = vadd.f32 %v1204_v10, %v1196_v7  ;;  %v1205_v19 = vsub.f32 %v936_v15, %v1181_v50  ;;  %v1290_v45 = vmul.f32 %v1282_v8, %v1266_v11 }
 0x205   :  { %v1005_v42 = vpop.f32.mrf.mxu1  ;;  %v1190_v10 = vmul.f32 %v1806_v32, %v1796_v23  ;;  %v1272_v11 = vadd.f32 0.0001, %v1264_v56  ;;  %v1273_v15 = vadd.f32 0.0001, %v1265_v24  ;;  %v1191_v23 = vmul.f32 %v1808_v33, %v1798_v25 }
 0x206   :  { %v1284_v46 = vadd.f32 0.0009, %v1276_v18  ;;  %v1277_v20 = vadd.f32 %v1205_v19, %v1197_v16  ;;  %v1291_v30 = vmul.f32 %v1283_v17, %v1267_v13  ;;  %v1206_v39 = vsub.f32 %v1005_v42, %v1182_v51 }
 0x207   :  { %v1007_v47 = vpop.f32.mrf.mxu1  ;;  %1371 = vrcp.f32 %v1290_v45  ;;  %v1201_v51 = vsub.f32 %v1820_v44, %v1836_v58  ;;  %v1220_v44 = vmul.f32 2.0, %v1844_v14  ;;  %v1189_v58 = vmul.f32 %v1804_v31, %v1794_v22 }
 0x208   :  { %v1292_v49 = vmul.f32 %v1284_v46, %v1268_v28  ;;  %v1285_v50 = vadd.f32 0.0009, %v1277_v20  ;;  %v1207_v52 = vsub.f32 %v1007_v47, %v1183_v5  ;;  %v1278_v60 = vadd.f32 %v1206_v39, %v1198_v29 }
 0x209   :  { %v1011_v61 = vpop.f32.mrf.mxu1  ;;  %1373 = vrcp.f32 %v1291_v30  ;;  %v1226_v18 = vadd.f32 0.0001, %v1218_v41  ;;  %v1227_v22 = vadd.f32 0.0001, %v1219_v57  ;;  %v1221_v31 = vmul.f32 2.0, %v1189_v58 }
 0x20a   :  { %v1293_v63 = vmul.f32 %v1285_v50, %v1269_v36  ;;  %v1279_v0 = vadd.f32 %v1207_v52, %v1199_v48  ;;  %v1208_v1 = vsub.f32 %v1011_v61, %v1184_v38  ;;  %v1286_v40 = vadd.f32 0.0009, %v1278_v60 }
 0x20b   :  { %v1013_v53 = vpop.f32.mrf.mxu1  ;;  %1375 = vrcp.f32 %v1292_v49  ;;  %v1222_v45 = vmul.f32 2.0, %v1190_v10  ;;  %v1229_v49 = vadd.f32 0.0001, %v1221_v31  ;;  %v1223_v25 = vmul.f32 2.0, %v1191_v23 }
 0x20c   :  { %v1287_v54 = vadd.f32 0.0009, %v1279_v0  ;;  %v1280_v2 = vadd.f32 %v1208_v1, %v1200_v59  ;;  %v1209_v3 = vsub.f32 %v1013_v53, %v1185_v21  ;;  %1377 = vrcp.f32 %v1293_v63 }
 0x20d   :  { %v1294_v4 = vmul.f32 %v1286_v40, %v1270_v43  ;;  %v1082_v5 = vpop.f32.mrf.mxu1  ;;  %v1228_v43 = vadd.f32 0.0001, %v1220_v44  ;;  %v1193_v33 = vmul.f32 %v1812_v35, %v1802_v27  ;;  %v1230_v61 = vadd.f32 0.0001, %v1222_v45 }
 0x20e   :  { %v1295_v6 = vmul.f32 %v1287_v54, %v1271_v55  ;;  %v1288_v7 = vadd.f32 0.0009, %v1280_v2  ;;  %v1281_v8 = vadd.f32 %v1209_v3, %v1201_v51  ;;  %v1210_v9 = vsub.f32 %v1082_v5, %v1838_v62 }
 0x20f   :  { %v1084_v13 = vpop.f32.mrf.mxu1  ;;  %1379 = vrcp.f32 %v1294_v4  ;;  %v1231_v3 = vadd.f32 0.0001, %v1223_v25  ;;  %v1225_v27 = vmul.f32 2.0, %v1193_v33 }
 0x210   :  { %v1289_v16 = vadd.f32 0.0009, %v1281_v8  ;;  %v1234_v17 = vmul.f32 2.0, %v1210_v9  ;;  %v1296_v19 = vmul.f32 %v1288_v7, %v1272_v11  ;;  %v1211_v28 = vsub.f32 %v1084_v13, %v1842_v12 }
 0x211   :  { %v1088_v36 = vpop.f32.mrf.mxu1  ;;  %1381 = vrcp.f32 %v1295_v6  ;;  %v1192_v12 = vmul.f32 %v1810_v34, %v1800_v26 }
 0x212   :  { %v1297_v62 = vmul.f32 %v1289_v16, %v1273_v15  ;;  %v1242_v37 = vadd.f32 0.0009, %v1234_v17  ;;  %v1212_v38 = vsub.f32 %v1088_v36, %v1844_v14  ;;  %v1235_v32 = vmul.f32 2.0, %v1211_v28 }
 0x213   :  { %v1090_v42 = vpop.f32.mrf.mxu1  ;;  %1383 = vrcp.f32 %v1296_v19  ;;  %v1224_v63 = vmul.f32 2.0, %v1192_v12 }
 0x214   :  { %v1236_v46 = vmul.f32 2.0, %v1212_v38  ;;  %v1213_v20 = vsub.f32 %v1090_v42, %v1189_v58  ;;  %v1250_v21 = vmul.f32 %v1242_v37, %v1226_v18  ;;  %v1243_v29 = vadd.f32 0.0009, %v1235_v32  ;;  %v1372_v48 = vpop.eup %1371 }
 0x215   :  { %v1159_v30 = vpop.f32.mrf.mxu1  ;;  %1385 = vrcp.f32 %v1297_v62  ;;  %v1232_v15 = vadd.f32 0.0001, %v1224_v63  ;;  %v1233_v18 = vadd.f32 0.0001, %v1225_v27 }
 0x216   :  { %v1244_v14 = vadd.f32 0.0009, %v1236_v46  ;;  %v1237_v39 = vmul.f32 2.0, %v1213_v20  ;;  %v1214_v47 = vsub.f32 %v1159_v30, %v1190_v10  ;;  %v1251_v50 = vmul.f32 %v1243_v29, %v1227_v22  ;;  %v1374_v55 = vpop.eup %1373 }
 0x217   :  { %v1161_v52 = vpop.f32.mrf.mxu1  ;;  %v1299_v0 = vmul.f32 %v1372_v48, %v1250_v21 }
 0x218   :  { %v1252_v56 = vmul.f32 %v1244_v14, %v1228_v43  ;;  %v1245_v59 = vadd.f32 0.0009, %v1237_v39  ;;  %v1238_v26 = vmul.f32 2.0, %v1214_v47  ;;  %v1215_v34 = vsub.f32 %v1161_v52, %v1191_v23  ;;  %v1376_v60 = vpop.eup %1375 }
 0x219   :  { %v1301_v1 = vmul.f32 %v1374_v55, %v1251_v50  ;;  %v1165_v24 = vpop.f32.mrf.mxu1  ;;  %v1378_v51 = vpop.eup %1377 }
 0x21a   :  { %v1303_v40 = vmul.f32 %v1376_v60, %v1252_v56  ;;  %v1253_v53 = vmul.f32 %v1245_v59, %v1229_v49  ;;  %v1246_v54 = vadd.f32 0.0009, %v1238_v26  ;;  %v1239_v2 = vmul.f32 2.0, %v1215_v34 }
 0x21b   :  { %v1314_v35 = vadd.f32 %v1301_v1, %v1299_v0  ;;  %v1216_v41 = vsub.f32 %v1165_v24, %v1192_v12  ;;  %v1167_v57 = vpop.f32.mrf.mxu1 }
 0x21c   :  { %v1305_v4 = vmul.f32 %v1378_v51, %v1253_v53  ;;  %v1254_v5 = vmul.f32 %v1246_v54, %v1230_v61  ;;  %v1247_v6 = vadd.f32 0.0009, %v1239_v2  ;;  %v1217_v7 = vsub.f32 %v1167_v57, %v1193_v33  ;;  %v1380_v8 = vpop.eup %1379 }
 0x21d   :  { %v1315_v9 = vadd.f32 %v1314_v35, %v1303_v40  ;;  %v1240_v44 = vmul.f32 2.0, %v1216_v41 }
 0x21e   :  { %v1307_v58 = vmul.f32 %v1380_v8, %v1254_v5  ;;  %v1255_v10 = vmul.f32 %v1247_v6, %v1231_v3  ;;  %v1241_v11 = vmul.f32 2.0, %v1217_v7  ;;  %v1382_v13 = vpop.eup %1381 }
 0x21f   :  { %v1316_v16 = vadd.f32 %v1315_v9, %v1305_v4  ;;  %v1248_v17 = vadd.f32 0.0009, %v1240_v44 }
 0x220   :  { %v1309_v19 = vmul.f32 %v1382_v13, %v1255_v10  ;;  %v1249_v28 = vadd.f32 0.0009, %v1241_v11  ;;  %v1384_v37 = vpop.eup %1383 }
 0x221   :  { %v1256_v36 = vmul.f32 %v1248_v17, %v1232_v15  ;;  %v1317_v62 = vadd.f32 %v1316_v16, %v1307_v58 }
 0x222   :  { %v1257_v38 = vmul.f32 %v1249_v28, %v1233_v18  ;;  %v1386_v22 = vpop.eup %1385 }
 0x223   :  { %v1311_v31 = vmul.f32 %v1384_v37, %v1256_v36  ;;  %v1318_v23 = vadd.f32 %v1317_v62, %v1309_v19 }
 0x224   :  { %v1313_v32 = vmul.f32 %v1386_v22, %v1257_v38 }
 0x225   :  { %v1319_v42 = vadd.f32 %v1318_v23, %v1311_v31 }
 0x227   :  { %v1320_v43 = vadd.f32 %v1319_v42, %v1313_v32 }
 0x229   :  { %1321 = vadd.xlane.f32.xlu0 %v1320_v43 }
 0x2b2   :  { %v1322_v45 = vpop.xlane.xlu0 %1321 }
 0x2b3   :  { %v1323_v46 = vrot.slane %v1322_v45, 4 }
 0x2b5   :  { %v1324_v20 = vadd.f32 %v1323_v46, %v1322_v45 }
 0x2b7   :  { %v1325_v12 = vrot.slane %v1324_v20, 2 }
 0x2b9   :  { %v1326_v21 = vadd.f32 %v1325_v12, %v1324_v20 }
 0x2bb   :  { %v1327_v29 = vrot.slane %v1326_v21, 1 }
 0x2bd   :  { %v1328_v30 = vadd.f32 %v1327_v29, %v1326_v21 }
 0x2bf   :  { %1367 = vpush %v1328_v30 }
 0x2f0   :  { %s1368_s0 = spop %1367 }
 0x2f1   :  { %v1330_v14 = vstv %s1368_s0 }
 0x2f2   :  { %1332 = vst.msk [vmem:[#allocation3] sm:$0x1] %vm1331_vm1, %v1330_v14 }
 0x2f3   :  { %1398 = shalt.err (!%p1395_p4)
}
 0x2f4   :  { %1342 = dma.vmem_to_hbm [thread:$0]  %s1340_s20, 16, %s1879_s4, [#allocation4]  }
 0x2f5   :  { %1407 = dma.done.wait [#allocation4], 16  }
 0x2f6   :  { %1408 = vsyncadd [#allocation4], 4294967280 }
 0x2f7   :  { %1346 = vsyncpa [#allocation4], 1 }

</bundles_post_ra>
